<compile_context>
chip_gen: v7x
topology: tpu7x:2x2x1
jax: 0.10.0
libtpu: 0.0.40
codegen_flags: <defaults>
</compile_context>

<pallas_src>
import functools

import jax
import jax.numpy as jnp
import numpy as np
from jax.experimental import pallas as pl
from jax.experimental.pallas import tpu as pltpu


def _round_up(n, m):
    return ((n + m - 1) // m) * m


def pack_qcg_params(params):
    """One-time packing of module weights into MXU-friendly padded slabs.

    Call this ONLY when the parameters change, never per forward call: the kernel is a
    few microseconds, so per-call packing ops would dominate wall clock.
    """
    H, F = params["w_ih_g"].shape
    G = params["w_fc"].shape[0]
    HP = max(128, _round_up(2 * H, 128))      # packed hidden [h_gate | h_graph | 0]
    GP = max(128, _round_up(G, 128))          # lane-dense logits

    def n(x):
        return np.asarray(x, np.float32)

    # Input-to-hidden for both RNNs side by side.
    wih = np.zeros((F, HP), np.float32)
    wih[:, 0:H] = n(params["w_ih_g"]).T
    wih[:, H:2 * H] = n(params["w_ih_r"]).T

    # First-step recurrence weight: both RNNs start from the same h0, and
    # [h0 | h0 | 0] @ blockdiag(Whg^T, Whr^T, 0) == h0 @ [Whg^T | Whr^T | 0],
    # so the packed initial hidden never has to be built.
    whh0 = np.zeros((H, HP), np.float32)
    whh0[:, 0:H] = n(params["w_hh_g"]).T
    whh0[:, H:2 * H] = n(params["w_hh_r"]).T

    # Block-diagonal hidden-to-hidden (both RNNs fused into one (HP,HP) matmul).
    whh = np.zeros((HP, HP), np.float32)
    whh[0:H, 0:H] = n(params["w_hh_g"]).T
    whh[H:2 * H, H:2 * H] = n(params["w_hh_r"]).T

    # RNN biases (ih + hh), folded into the hoisted input projection in-kernel.
    b = np.zeros((1, HP), np.float32)
    b[0, 0:H] = n(params["b_ih_g"]) + n(params["b_hh_g"])
    b[0, H:2 * H] = n(params["b_ih_r"]) + n(params["b_hh_r"])

    # fc weight; fc BIAS intentionally dropped: it is constant across the sequence
    # axis over which the softmax is taken, so it cancels exactly.
    wfc = np.zeros((HP, GP), np.float32)
    wfc[0:H, 0:G] = n(params["w_fc"]).T

    return {
        "wih": jnp.asarray(wih, jnp.float32),
        # Recurrence weights pre-cast to bf16 -> single-pass MXU push per serial step.
        "whh0": jnp.asarray(whh0, jnp.bfloat16),
        "whh": jnp.asarray(whh, jnp.bfloat16),
        "b": jnp.asarray(b, jnp.float32),
        "wfc": jnp.asarray(wfc, jnp.float32),
    }


def qcg_kernel(x_ref, h_ref, wih_ref, whh0_ref, whh_ref, b_ref, wfc_ref,
               gamma_ref, hcat_ref, h_all):
    """Fused GatePredictor-RNN + GraphRNN recurrence + batched Linear + softmax(seq).

    Shapes inside the kernel:
      x:     (B, T, F)   f32   raw graph_state (no host-side reorder/pad)
      h:     (1, B, H)   f32   initial hidden state for both RNNs
      wih:   (F, HP)     f32   [W_ih_g^T | W_ih_r^T | 0]
      whh0:  (H, HP)     bf16  [W_hh_g^T | W_hh_r^T | 0]        (first step only)
      whh:   (HP, HP)    bf16  blockdiag(W_hh_g^T, W_hh_r^T)
      b:     (1, HP)     f32   [(b_ih_g+b_hh_g) | (b_ih_r+b_hh_r) | 0]
      wfc:   (HP, GP)    f32   rows 0:H = W_fc^T, rest 0 (fc bias cancelled by softmax)
      gamma: (B, T, GP)  f32   softmax over axis 1 (the sequence axis)
      hcat:  (B, HP)     f32   final packed hidden [h_gate | h_graph | 0]
    """
    B, T, F = x_ref.shape
    HP = whh_ref.shape[0]
    GP = wfc_ref.shape[1]

    # (1) Hoisted input projection (+ fused RNN biases) for both RNNs: one
    #     (B*T, F) @ (F, HP) matmul + one broadcast add, fully off the serial path.
    xp = (jnp.dot(x_ref[...].reshape(B * T, F), wih_ref[...],
                  preferred_element_type=jnp.float32)
          + b_ref[...])                                       # (B*T, HP)
    xp = xp.reshape(B, T, HP)

    whh = whh_ref[...]                                        # bf16, hoisted

    # (2) Fused recurrence: one (B,HP)x(HP,HP) bf16 MXU push + f32 tanh per step.
    #     T is small & static -> fully unrolled Python loop, h_cat stays in vregs.
    h0 = h_ref[0].astype(jnp.bfloat16)                        # (B, H)
    h_cat = jnp.tanh(xp[:, 0, :]
                     + jnp.dot(h0, whh0_ref[...],
                               preferred_element_type=jnp.float32))
    h_all[:, 0, :] = h_cat
    for t in range(1, T):
        h_cat = jnp.tanh(xp[:, t, :]
                         + jnp.dot(h_cat.astype(jnp.bfloat16), whh,
                                   preferred_element_type=jnp.float32))
        h_all[:, t, :] = h_cat
    hcat_ref[...] = h_cat

    # (3) Batched fc over all timesteps (single matmul). Only rows 0:H of wfc are
    #     nonzero, so only the GatePredictor half of the packed hidden contributes.
    z = jnp.dot(h_all[...].reshape(B * T, HP), wfc_ref[...],
                preferred_element_type=jnp.float32).reshape(B, T, GP)

    # Softmax over the SEQUENCE axis (PyTorch nn.Softmax(dim=1) on a (B,T,G) tensor).
    m = jnp.max(z, axis=1, keepdims=True)
    e = jnp.exp(z - m)
    denom = jnp.sum(e, axis=1, keepdims=True)
    gamma_ref[...] = e * pl.reciprocal(denom, approx=True)


@functools.partial(jax.jit, static_argnames=("num_gate_types",))
def quantum_circuit_generator_forward(graph_state, h, packed, *, num_gate_types):
    """Per-call forward: a single pallas_call plus two fused slices."""
    B, T, F = graph_state.shape
    H = h.shape[-1]
    HP = packed["whh"].shape[0]
    GP = packed["wfc"].shape[1]
    f32 = jnp.float32

    vmem = lambda: pl.BlockSpec(memory_space=pltpu.MemorySpace.VMEM)
    args = (graph_state.astype(f32), h.astype(f32),
            packed["wih"], packed["whh0"], packed["whh"],
            packed["b"], packed["wfc"])

    gamma_pad, h_cat = pl.pallas_call(
        qcg_kernel,
        out_shape=(
            jax.ShapeDtypeStruct((B, T, GP), f32),
            jax.ShapeDtypeStruct((B, HP), f32),
        ),
        in_specs=[vmem() for _ in args],
        out_specs=(vmem(), vmem()),
        scratch_shapes=[pltpu.VMEM((B, T, HP), f32)],
    )(*args)

    gamma = gamma_pad[:, :, :num_gate_types]            # (B, T, G)
    h_new = h_cat[:, H:2 * H].reshape(1, B, H)           # GraphRNN final hidden state
    return graph_state, h_new, gamma


def reference_forward(graph_state, h, params):
    """Pure-JAX f32 reference mirroring the PyTorch semantics, for validation."""
    B, T, F = graph_state.shape
    H = h.shape[-1]
    h_g = h[0]
    h_r = h[0]
    logits = []
    for t in range(T):
        x_t = graph_state[:, t, :]
        h_g = jnp.tanh(x_t @ params["w_ih_g"].T + params["b_ih_g"]
                       + h_g @ params["w_hh_g"].T + params["b_hh_g"])
        logits.append(h_g @ params["w_fc"].T + params["b_fc"])
        h_r = jnp.tanh(x_t @ params["w_ih_r"].T + params["b_ih_r"]
                       + h_r @ params["w_hh_r"].T + params["b_hh_r"])
    z = jnp.stack(logits, axis=1)                        # (B, T, G)
    gamma = jax.nn.softmax(z, axis=1)                    # softmax over seq axis
    return graph_state, h_r.reshape(1, B, H), gamma


if __name__ == "__main__":
    # Small, forward-consistent shapes.
    GATE_TYPE_MAP = {"rx": 0, "ry": 1, "rz": 2, "cx": 3, "id": 4}
    B = 2                    # batch
    T = 8                    # window_size (sequence length)
    F = 8                    # node_feature_dim
    H = 32                   # hidden_dim
    G = len(GATE_TYPE_MAP)   # num_gate_types

    key = jax.random.PRNGKey(0)
    keys = jax.random.split(key, 14)
    s = 1.0 / np.sqrt(H)

    def u(k, shape):
        return jax.random.uniform(k, shape, dtype=jnp.float32, minval=-s, maxval=s)

    params = {
        # GatePredictor RNN + Linear
        "w_ih_g": u(keys[0], (H, F)),
        "w_hh_g": u(keys[1], (H, H)),
        "b_ih_g": u(keys[2], (H,)),
        "b_hh_g": u(keys[3], (H,)),
        "w_fc":   u(keys[4], (G, H)),
        "b_fc":   u(keys[5], (G,)),
        # GraphRNN
        "w_ih_r": u(keys[6], (H, F)),
        "w_hh_r": u(keys[7], (H, H)),
        "b_ih_r": u(keys[8], (H,)),
        "b_hh_r": u(keys[9], (H,)),
    }

    graph_state = jax.random.normal(keys[10], (B, T, F), dtype=jnp.float32)
    h = jax.random.normal(keys[11], (1, B, H), dtype=jnp.float32)

    # Pack weights ONCE (out of the per-call path), then run the forward.
    packed = pack_qcg_params(params)
    gs_out, h_new, gamma = quantum_circuit_generator_forward(
        graph_state, h, packed, num_gate_types=G)
    jax.block_until_ready((gs_out, h_new, gamma))

    # Validate against the pure-JAX f32 reference.  Tolerance relaxed slightly vs 1e-3
    # because the recurrence matmuls use bf16 operands (f32 accumulation) per the
    # performance review; errors over 8 tanh steps stay well below 1e-2.
    gs_ref, h_ref, gamma_ref = reference_forward(graph_state, h, params)
    np.testing.assert_allclose(np.asarray(h_new), np.asarray(h_ref), rtol=1e-2, atol=1e-2)
    np.testing.assert_allclose(np.asarray(gamma), np.asarray(gamma_ref), rtol=1e-2, atol=1e-2)
    assert gamma.shape == (B, T, G) and h_new.shape == (1, B, H)

    print("KERNEL_OK")
</pallas_src>

<mosaic_0001>
module attributes {stable_mosaic.version = 11 : i64} {
  func.func @qcg_kernel(%arg0: memref<2x8x8xf32, #tpu.memory_space<vmem>>, %arg1: memref<1x2x32xf32, #tpu.memory_space<vmem>>, %arg2: memref<8x128xf32, #tpu.memory_space<vmem>>, %arg3: memref<32x128xbf16, #tpu.memory_space<vmem>>, %arg4: memref<128x128xbf16, #tpu.memory_space<vmem>>, %arg5: memref<1x128xf32, #tpu.memory_space<vmem>>, %arg6: memref<128x128xf32, #tpu.memory_space<vmem>>, %arg7: memref<2x8x128xf32, #tpu.memory_space<vmem>>, %arg8: memref<2x128xf32, #tpu.memory_space<vmem>>, %arg9: memref<2x8x128xf32, #tpu.memory_space<vmem>>) attributes {dimension_semantics = [], scalar_prefetch = 0 : i64, scratch_operands = 1 : i64, tpu.core_type = #tpu.core_type<tc>} {
    %c0 = arith.constant 0 : index
    %c0_0 = arith.constant 0 : index
    %c0_1 = arith.constant 0 : index
    %0 = vector.load %arg0[%c0, %c0_0, %c0_1] : memref<2x8x8xf32, #tpu.memory_space<vmem>>, vector<2x8x8xf32>
    %1 = vector.shape_cast %0 : vector<2x8x8xf32> to vector<16x8xf32>
    %c0_2 = arith.constant 0 : index
    %c0_3 = arith.constant 0 : index
    %2 = vector.load %arg2[%c0_2, %c0_3] : memref<8x128xf32, #tpu.memory_space<vmem>>, vector<8x128xf32>
    %cst = arith.constant dense<0.000000e+00> : vector<16x128xf32>
    %3 = tpu.matmul %1, %2, %cst {dimension_numbers = #tpu.dot_dimension_numbers<[1], [0], [0], [1], [0, 0, 1, 1], [], []>} : vector<16x8xf32>, vector<8x128xf32>, vector<16x128xf32> -> vector<16x128xf32>
    %c0_4 = arith.constant 0 : index
    %c0_5 = arith.constant 0 : index
    %4 = vector.load %arg5[%c0_4, %c0_5] : memref<1x128xf32, #tpu.memory_space<vmem>>, vector<1x128xf32>
    %5 = vector.broadcast %4 : vector<1x128xf32> to vector<16x128xf32>
    %6 = arith.addf %3, %5 : vector<16x128xf32>
    %7 = vector.shape_cast %6 : vector<16x128xf32> to vector<2x8x128xf32>
    %c0_6 = arith.constant 0 : index
    %c0_7 = arith.constant 0 : index
    %8 = vector.load %arg4[%c0_6, %c0_7] : memref<128x128xbf16, #tpu.memory_space<vmem>>, vector<128x128xbf16>
    %c0_8 = arith.constant 0 : index
    %c0_9 = arith.constant 0 : index
    %c0_10 = arith.constant 0 : index
    %9 = vector.load %arg1[%c0_8, %c0_9, %c0_10] : memref<1x2x32xf32, #tpu.memory_space<vmem>>, vector<1x2x32xf32>
    %10 = vector.shape_cast %9 : vector<1x2x32xf32> to vector<2x32xf32>
    %11 = arith.truncf %10 : vector<2x32xf32> to vector<2x32xbf16>
    %12 = vector.extract_strided_slice %7 {offsets = [0, 0, 0], sizes = [2, 1, 128], strides = [1, 1, 1]} : vector<2x8x128xf32> to vector<2x1x128xf32>
    %13 = vector.shape_cast %12 : vector<2x1x128xf32> to vector<2x128xf32>
    %c0_11 = arith.constant 0 : index
    %c0_12 = arith.constant 0 : index
    %14 = vector.load %arg3[%c0_11, %c0_12] : memref<32x128xbf16, #tpu.memory_space<vmem>>, vector<32x128xbf16>
    %cst_13 = arith.constant dense<0.000000e+00> : vector<2x128xf32>
    %15 = tpu.matmul %11, %14, %cst_13 {dimension_numbers = #tpu.dot_dimension_numbers<[1], [0], [0], [1], [0, 0, 1, 1], [], []>} : vector<2x32xbf16>, vector<32x128xbf16>, vector<2x128xf32> -> vector<2x128xf32>
    %16 = arith.addf %13, %15 : vector<2x128xf32>
    %17 = math.tanh %16 : vector<2x128xf32>
    %c0_14 = arith.constant 0 : index
    %c0_15 = arith.constant 0 : index
    %c0_16 = arith.constant 0 : index
    %18 = vector.load %arg9[%c0_14, %c0_15, %c0_16] : memref<2x8x128xf32, #tpu.memory_space<vmem>>, vector<2x1x128xf32>
    %19 = vector.shape_cast %18 : vector<2x1x128xf32> to vector<2x128xf32>
    %20 = vector.shape_cast %17 : vector<2x128xf32> to vector<2x1x128xf32>
    tpu.vector_store %arg9[%c0_14, %c0_15, %c0_16], %20 {strides = array<i32>} : memref<2x8x128xf32, #tpu.memory_space<vmem>>, vector<2x1x128xf32>,
    %21 = vector.extract_strided_slice %7 {offsets = [0, 1, 0], sizes = [2, 1, 128], strides = [1, 1, 1]} : vector<2x8x128xf32> to vector<2x1x128xf32>
    %22 = vector.shape_cast %21 : vector<2x1x128xf32> to vector<2x128xf32>
    %23 = arith.truncf %17 : vector<2x128xf32> to vector<2x128xbf16>
    %cst_17 = arith.constant dense<0.000000e+00> : vector<2x128xf32>
    %24 = tpu.matmul %23, %8, %cst_17 {dimension_numbers = #tpu.dot_dimension_numbers<[1], [0], [0], [1], [0, 0, 1, 1], [], []>} : vector<2x128xbf16>, vector<128x128xbf16>, vector<2x128xf32> -> vector<2x128xf32>
    %25 = arith.addf %22, %24 : vector<2x128xf32>
    %26 = math.tanh %25 : vector<2x128xf32>
    %c0_18 = arith.constant 0 : index
    %c1 = arith.constant 1 : index
    %c0_19 = arith.constant 0 : index
    %27 = vector.load %arg9[%c0_18, %c1, %c0_19] : memref<2x8x128xf32, #tpu.memory_space<vmem>>, vector<2x1x128xf32>
    %28 = vector.shape_cast %27 : vector<2x1x128xf32> to vector<2x128xf32>
    %29 = vector.shape_cast %26 : vector<2x128xf32> to vector<2x1x128xf32>
    tpu.vector_store %arg9[%c0_18, %c1, %c0_19], %29 {strides = array<i32>} : memref<2x8x128xf32, #tpu.memory_space<vmem>>, vector<2x1x128xf32>,
    %30 = vector.extract_strided_slice %7 {offsets = [0, 2, 0], sizes = [2, 1, 128], strides = [1, 1, 1]} : vector<2x8x128xf32> to vector<2x1x128xf32>
    %31 = vector.shape_cast %30 : vector<2x1x128xf32> to vector<2x128xf32>
    %32 = arith.truncf %26 : vector<2x128xf32> to vector<2x128xbf16>
    %cst_20 = arith.constant dense<0.000000e+00> : vector<2x128xf32>
    %33 = tpu.matmul %32, %8, %cst_20 {dimension_numbers = #tpu.dot_dimension_numbers<[1], [0], [0], [1], [0, 0, 1, 1], [], []>} : vector<2x128xbf16>, vector<128x128xbf16>, vector<2x128xf32> -> vector<2x128xf32>
    %34 = arith.addf %31, %33 : vector<2x128xf32>
    %35 = math.tanh %34 : vector<2x128xf32>
    %c0_21 = arith.constant 0 : index
    %c2 = arith.constant 2 : index
    %c0_22 = arith.constant 0 : index
    %36 = vector.load %arg9[%c0_21, %c2, %c0_22] : memref<2x8x128xf32, #tpu.memory_space<vmem>>, vector<2x1x128xf32>
    %37 = vector.shape_cast %36 : vector<2x1x128xf32> to vector<2x128xf32>
    %38 = vector.shape_cast %35 : vector<2x128xf32> to vector<2x1x128xf32>
    tpu.vector_store %arg9[%c0_21, %c2, %c0_22], %38 {strides = array<i32>} : memref<2x8x128xf32, #tpu.memory_space<vmem>>, vector<2x1x128xf32>,
    %39 = vector.extract_strided_slice %7 {offsets = [0, 3, 0], sizes = [2, 1, 128], strides = [1, 1, 1]} : vector<2x8x128xf32> to vector<2x1x128xf32>
    %40 = vector.shape_cast %39 : vector<2x1x128xf32> to vector<2x128xf32>
    %41 = arith.truncf %35 : vector<2x128xf32> to vector<2x128xbf16>
    %cst_23 = arith.constant dense<0.000000e+00> : vector<2x128xf32>
    %42 = tpu.matmul %41, %8, %cst_23 {dimension_numbers = #tpu.dot_dimension_numbers<[1], [0], [0], [1], [0, 0, 1, 1], [], []>} : vector<2x128xbf16>, vector<128x128xbf16>, vector<2x128xf32> -> vector<2x128xf32>
    %43 = arith.addf %40, %42 : vector<2x128xf32>
    %44 = math.tanh %43 : vector<2x128xf32>
    %c0_24 = arith.constant 0 : index
    %c3 = arith.constant 3 : index
    %c0_25 = arith.constant 0 : index
    %45 = vector.load %arg9[%c0_24, %c3, %c0_25] : memref<2x8x128xf32, #tpu.memory_space<vmem>>, vector<2x1x128xf32>
    %46 = vector.shape_cast %45 : vector<2x1x128xf32> to vector<2x128xf32>
    %47 = vector.shape_cast %44 : vector<2x128xf32> to vector<2x1x128xf32>
    tpu.vector_store %arg9[%c0_24, %c3, %c0_25], %47 {strides = array<i32>} : memref<2x8x128xf32, #tpu.memory_space<vmem>>, vector<2x1x128xf32>,
    %48 = vector.extract_strided_slice %7 {offsets = [0, 4, 0], sizes = [2, 1, 128], strides = [1, 1, 1]} : vector<2x8x128xf32> to vector<2x1x128xf32>
    %49 = vector.shape_cast %48 : vector<2x1x128xf32> to vector<2x128xf32>
    %50 = arith.truncf %44 : vector<2x128xf32> to vector<2x128xbf16>
    %cst_26 = arith.constant dense<0.000000e+00> : vector<2x128xf32>
    %51 = tpu.matmul %50, %8, %cst_26 {dimension_numbers = #tpu.dot_dimension_numbers<[1], [0], [0], [1], [0, 0, 1, 1], [], []>} : vector<2x128xbf16>, vector<128x128xbf16>, vector<2x128xf32> -> vector<2x128xf32>
    %52 = arith.addf %49, %51 : vector<2x128xf32>
    %53 = math.tanh %52 : vector<2x128xf32>
    %c0_27 = arith.constant 0 : index
    %c4 = arith.constant 4 : index
    %c0_28 = arith.constant 0 : index
    %54 = vector.load %arg9[%c0_27, %c4, %c0_28] : memref<2x8x128xf32, #tpu.memory_space<vmem>>, vector<2x1x128xf32>
    %55 = vector.shape_cast %54 : vector<2x1x128xf32> to vector<2x128xf32>
    %56 = vector.shape_cast %53 : vector<2x128xf32> to vector<2x1x128xf32>
    tpu.vector_store %arg9[%c0_27, %c4, %c0_28], %56 {strides = array<i32>} : memref<2x8x128xf32, #tpu.memory_space<vmem>>, vector<2x1x128xf32>,
    %57 = vector.extract_strided_slice %7 {offsets = [0, 5, 0], sizes = [2, 1, 128], strides = [1, 1, 1]} : vector<2x8x128xf32> to vector<2x1x128xf32>
    %58 = vector.shape_cast %57 : vector<2x1x128xf32> to vector<2x128xf32>
    %59 = arith.truncf %53 : vector<2x128xf32> to vector<2x128xbf16>
    %cst_29 = arith.constant dense<0.000000e+00> : vector<2x128xf32>
    %60 = tpu.matmul %59, %8, %cst_29 {dimension_numbers = #tpu.dot_dimension_numbers<[1], [0], [0], [1], [0, 0, 1, 1], [], []>} : vector<2x128xbf16>, vector<128x128xbf16>, vector<2x128xf32> -> vector<2x128xf32>
    %61 = arith.addf %58, %60 : vector<2x128xf32>
    %62 = math.tanh %61 : vector<2x128xf32>
    %c0_30 = arith.constant 0 : index
    %c5 = arith.constant 5 : index
    %c0_31 = arith.constant 0 : index
    %63 = vector.load %arg9[%c0_30, %c5, %c0_31] : memref<2x8x128xf32, #tpu.memory_space<vmem>>, vector<2x1x128xf32>
    %64 = vector.shape_cast %63 : vector<2x1x128xf32> to vector<2x128xf32>
    %65 = vector.shape_cast %62 : vector<2x128xf32> to vector<2x1x128xf32>
    tpu.vector_store %arg9[%c0_30, %c5, %c0_31], %65 {strides = array<i32>} : memref<2x8x128xf32, #tpu.memory_space<vmem>>, vector<2x1x128xf32>,
    %66 = vector.extract_strided_slice %7 {offsets = [0, 6, 0], sizes = [2, 1, 128], strides = [1, 1, 1]} : vector<2x8x128xf32> to vector<2x1x128xf32>
    %67 = vector.shape_cast %66 : vector<2x1x128xf32> to vector<2x128xf32>
    %68 = arith.truncf %62 : vector<2x128xf32> to vector<2x128xbf16>
    %cst_32 = arith.constant dense<0.000000e+00> : vector<2x128xf32>
    %69 = tpu.matmul %68, %8, %cst_32 {dimension_numbers = #tpu.dot_dimension_numbers<[1], [0], [0], [1], [0, 0, 1, 1], [], []>} : vector<2x128xbf16>, vector<128x128xbf16>, vector<2x128xf32> -> vector<2x128xf32>
    %70 = arith.addf %67, %69 : vector<2x128xf32>
    %71 = math.tanh %70 : vector<2x128xf32>
    %c0_33 = arith.constant 0 : index
    %c6 = arith.constant 6 : index
    %c0_34 = arith.constant 0 : index
    %72 = vector.load %arg9[%c0_33, %c6, %c0_34] : memref<2x8x128xf32, #tpu.memory_space<vmem>>, vector<2x1x128xf32>
    %73 = vector.shape_cast %72 : vector<2x1x128xf32> to vector<2x128xf32>
    %74 = vector.shape_cast %71 : vector<2x128xf32> to vector<2x1x128xf32>
    tpu.vector_store %arg9[%c0_33, %c6, %c0_34], %74 {strides = array<i32>} : memref<2x8x128xf32, #tpu.memory_space<vmem>>, vector<2x1x128xf32>,
    %75 = vector.extract_strided_slice %7 {offsets = [0, 7, 0], sizes = [2, 1, 128], strides = [1, 1, 1]} : vector<2x8x128xf32> to vector<2x1x128xf32>
    %76 = vector.shape_cast %75 : vector<2x1x128xf32> to vector<2x128xf32>
    %77 = arith.truncf %71 : vector<2x128xf32> to vector<2x128xbf16>
    %cst_35 = arith.constant dense<0.000000e+00> : vector<2x128xf32>
    %78 = tpu.matmul %77, %8, %cst_35 {dimension_numbers = #tpu.dot_dimension_numbers<[1], [0], [0], [1], [0, 0, 1, 1], [], []>} : vector<2x128xbf16>, vector<128x128xbf16>, vector<2x128xf32> -> vector<2x128xf32>
    %79 = arith.addf %76, %78 : vector<2x128xf32>
    %80 = math.tanh %79 : vector<2x128xf32>
    %c0_36 = arith.constant 0 : index
    %c7 = arith.constant 7 : index
    %c0_37 = arith.constant 0 : index
    %81 = vector.load %arg9[%c0_36, %c7, %c0_37] : memref<2x8x128xf32, #tpu.memory_space<vmem>>, vector<2x1x128xf32>
    %82 = vector.shape_cast %81 : vector<2x1x128xf32> to vector<2x128xf32>
    %83 = vector.shape_cast %80 : vector<2x128xf32> to vector<2x1x128xf32>
    tpu.vector_store %arg9[%c0_36, %c7, %c0_37], %83 {strides = array<i32>} : memref<2x8x128xf32, #tpu.memory_space<vmem>>, vector<2x1x128xf32>,
    %c0_38 = arith.constant 0 : index
    %c0_39 = arith.constant 0 : index
    %84 = vector.load %arg8[%c0_38, %c0_39] : memref<2x128xf32, #tpu.memory_space<vmem>>, vector<2x128xf32>
    tpu.vector_store %arg8[%c0_38, %c0_39], %80 {strides = array<i32>} : memref<2x128xf32, #tpu.memory_space<vmem>>, vector<2x128xf32>,
    %c0_40 = arith.constant 0 : index
    %c0_41 = arith.constant 0 : index
    %c0_42 = arith.constant 0 : index
    %85 = vector.load %arg9[%c0_40, %c0_41, %c0_42] : memref<2x8x128xf32, #tpu.memory_space<vmem>>, vector<2x8x128xf32>
    %86 = vector.shape_cast %85 : vector<2x8x128xf32> to vector<16x128xf32>
    %c0_43 = arith.constant 0 : index
    %c0_44 = arith.constant 0 : index
    %87 = vector.load %arg6[%c0_43, %c0_44] : memref<128x128xf32, #tpu.memory_space<vmem>>, vector<128x128xf32>
    %cst_45 = arith.constant dense<0.000000e+00> : vector<16x128xf32>
    %88 = tpu.matmul %86, %87, %cst_45 {dimension_numbers = #tpu.dot_dimension_numbers<[1], [0], [0], [1], [0, 0, 1, 1], [], []>} : vector<16x128xf32>, vector<128x128xf32>, vector<16x128xf32> -> vector<16x128xf32>
    %89 = vector.shape_cast %88 : vector<16x128xf32> to vector<2x8x128xf32>
    %cst_46 = arith.constant dense<0xFF800000> : vector<2x128xf32>
    %90 = vector.multi_reduction <maximumf>, %89, %cst_46 [1] : vector<2x8x128xf32> to vector<2x128xf32>
    %91 = vector.shape_cast %90 : vector<2x128xf32> to vector<2x1x128xf32>
    %92 = vector.broadcast %91 : vector<2x1x128xf32> to vector<2x8x128xf32>
    %93 = arith.subf %89, %92 : vector<2x8x128xf32>
    %94 = math.exp %93 : vector<2x8x128xf32>
    %cst_47 = arith.constant dense<0.000000e+00> : vector<2x128xf32>
    %95 = vector.multi_reduction <add>, %94, %cst_47 [1] : vector<2x8x128xf32> to vector<2x128xf32>
    %96 = vector.shape_cast %95 : vector<2x128xf32> to vector<2x1x128xf32>
    %97 = tpu.reciprocal %96 {approx = true} : vector<2x1x128xf32> -> vector<2x1x128xf32>
    %98 = vector.broadcast %97 : vector<2x1x128xf32> to vector<2x8x128xf32>
    %99 = arith.mulf %94, %98 : vector<2x8x128xf32>
    %c0_48 = arith.constant 0 : index
    %c0_49 = arith.constant 0 : index
    %c0_50 = arith.constant 0 : index
    %100 = vector.load %arg7[%c0_48, %c0_49, %c0_50] : memref<2x8x128xf32, #tpu.memory_space<vmem>>, vector<2x8x128xf32>
    tpu.vector_store %arg7[%c0_48, %c0_49, %c0_50], %99 {strides = array<i32>} : memref<2x8x128xf32, #tpu.memory_space<vmem>>, vector<2x8x128xf32>,
    return
  }
}

</mosaic_0001>

<bundles_post_ra>
// kernel: quantum_circuit_generator_forward.1
= control target key start
LH: loop header
LB: loop body
LE: loop exit
PB: predicated region body
PF: predicated region fallthrough
CT: control target
= control target key end

     0   :  { %14 = vsyncpa [#allocation4], 0  ;;  %s1670_s0 = inlined_call_operand.vmem [shape: f32[2,8,8], index: 0, kind: input, shape index: {}]   ;;  %s1671_s1 = inlined_call_operand.vmem [shape: f32[1,2,32], index: 1, kind: input, shape index: {}]   ;;  %s1672_s2 = inlined_call_operand.hbm [shape: f32[8,128], index: 2, kind: input, shape index: {}]   ;;  %s1673_s3 = inlined_call_operand.hbm [shape: bf16[32,128], index: 3, kind: input, shape index: {}]   ;;  %s1674_s4 = inlined_call_operand.hbm [shape: bf16[128,128], index: 4, kind: input, shape index: {}]   ;;  %s1675_s5 = inlined_call_operand.vmem [shape: f32[1,128], index: 5, kind: input, shape index: {}]   ;;  %s1676_s6 = inlined_call_operand.hbm [shape: f32[128,128], index: 6, kind: input, shape index: {}]   ;;  %s1677_s7 = inlined_call_operand.vmem [shape: f32[2,8,128], index: 7, kind: output, shape index: {0}]   ;;  %s1678_s8 = inlined_call_operand.vmem [shape: f32[2,128], index: 8, kind: output, shape index: {1}]  }
   0x1   :  { %15 = vsyncpa [#allocation6], 0 }
   0x2   :  { %16 = vsyncpa [#allocation9], 0  ;;  %s1364_s27 = smov [#allocation5]   ;;  %s1270_s9 = scalar_lea.hbm %s1673_s3, 256 }
   0x3   :  { %s36_s28 = sshll.u32 %s1364_s27, 4  ;;  %p1271_p0 = scmp.ne.s32.totalorder %s1673_s3, %s1270_s9  ;;  %s37_s28 = int_to_ptr.vmem [resolvable:$true] %s36_s28 }
   0x4   :  { %p1274_p1 = scmp.lt.u32.totalorder %s1270_s9, %s1673_s3 }
   0x6   :  { %p1276_p2 = pnand %p1274_p1, %p1271_p0 }
   0x8   :  { %1279 = shalt.err (!%p1276_p2)
}
   0x9   :  { %s1280_s14 = scalar_lea.vmem %s37_s28, 256  ;;  %p1285_p4 = scmp.lt.s32.totalorder %s37_s28, %s37_s28 }
   0xa   :  { %p1281_p3 = scmp.ne.s32.totalorder %s37_s28, %s1280_s14  ;;  %p1286_p5 = scmp.lt.s32.totalorder %s1280_s14, %s1280_s14 }
   0xc   :  { %p1287_p6 = por %p1286_p5, %p1285_p4 }
   0xe   :  { %p1288_p7 = pnand %p1287_p6, %p1281_p3 }
  0x10   :  { %1291 = shalt.err (!%p1288_p7)
}
  0x11   :  { %s1365_s15 = smov 64   ;;  %s1366_s16 = smov 4  }
  0x12   :  { %42 = dma.hbm_to_vmem [thread:$0]  %s1673_s3, 256, %s37_s28, [#allocation6], %s1365_s15, %s1365_s15, %s1366_s16  }
  0x13   :  { %s1367_s19 = smov [#allocation3]   ;;  %s1368_s21 = smov [#allocation7]  }
  0x14   :  { %s27_s20 = sshll.u32 %s1367_s19, 4  ;;  %s48_s22 = sshll.u32 %s1368_s21, 4  ;;  %s28_s20 = int_to_ptr.vmem [resolvable:$true] %s27_s20  ;;  %s49_s22 = int_to_ptr.vmem [resolvable:$true] %s48_s22 }
  0x15   :  { %s1292_s25 = scalar_lea.hbm %s1672_s2, 128 }
  0x16   :  { %p1293_p8 = scmp.ne.s32.totalorder %s1672_s2, %s1292_s25  ;;  %p1296_p9 = scmp.lt.u32.totalorder %s1292_s25, %s1672_s2 }
  0x18   :  { %p1298_p10 = pnand %p1296_p9, %p1293_p8 }
  0x1a   :  { %1301 = shalt.err (!%p1298_p10)
}
  0x1b   :  { %s1302_s3 = scalar_lea.vmem %s28_s20, 128  ;;  %p1307_p12 = scmp.lt.s32.totalorder %s28_s20, %s28_s20 }
  0x1c   :  { %p1303_p11 = scmp.ne.s32.totalorder %s28_s20, %s1302_s3  ;;  %p1308_p13 = scmp.lt.s32.totalorder %s1302_s3, %s1302_s3 }
  0x1e   :  { %p1309_p0 = por %p1308_p13, %p1307_p12 }
  0x20   :  { %p1310_p1 = pnand %p1309_p0, %p1303_p11 }
  0x22   :  { %1313 = shalt.err (!%p1310_p1)
}
  0x23   :  { %30 = dma.hbm_to_vmem [thread:$0]  %s1672_s2, 128, %s28_s20, [#allocation4]  }
  0x24   :  { %s1314_s12 = scalar_lea.hbm %s1674_s4, 1024 }
  0x25   :  { %p1315_p2 = scmp.ne.s32.totalorder %s1674_s4, %s1314_s12  ;;  %p1318_p3 = scmp.lt.u32.totalorder %s1314_s12, %s1674_s4 }
  0x27   :  { %p1320_p4 = pnand %p1318_p3, %p1315_p2 }
  0x29   :  { %1323 = shalt.err (!%p1320_p4)
}
  0x2a   :  { %s1324_s19 = scalar_lea.vmem %s49_s22, 1024  ;;  %p1329_p6 = scmp.lt.s32.totalorder %s49_s22, %s49_s22 }
  0x2b   :  { %p1325_p5 = scmp.ne.s32.totalorder %s49_s22, %s1324_s19  ;;  %p1330_p7 = scmp.lt.s32.totalorder %s1324_s19, %s1324_s19 }
  0x2d   :  { %p1331_p8 = por %p1330_p7, %p1329_p6 }
  0x2f   :  { %p1332_p9 = pnand %p1331_p8, %p1325_p5 }
  0x31   :  { %1335 = shalt.err (!%p1332_p9)
}
  0x32   :  { %54 = dma.hbm_to_vmem [thread:$0]  %s1674_s4, 1024, %s49_s22, [#allocation6], %s1365_s15, %s1365_s15, %s1366_s16  }
  0x33   :  { %s1369_s21 = smov [#allocation8]   ;;  %s1336_s26 = scalar_lea.hbm %s1676_s6, 2048 }
  0x34   :  { %s62_s23 = sshll.u32 %s1369_s21, 4  ;;  %p1337_p10 = scmp.ne.s32.totalorder %s1676_s6, %s1336_s26  ;;  %s63_s23 = int_to_ptr.vmem [resolvable:$true] %s62_s23 }
  0x35   :  { %p1340_p11 = scmp.lt.u32.totalorder %s1336_s26, %s1676_s6 }
  0x37   :  { %p1342_p12 = pnand %p1340_p11, %p1337_p10 }
  0x39   :  { %1345 = shalt.err (!%p1342_p12)
}
  0x3a   :  { %s1346_s28 = scalar_lea.vmem %s63_s23, 2048  ;;  %p1351_p0 = scmp.lt.s32.totalorder %s63_s23, %s63_s23 }
  0x3b   :  { %p1347_p13 = scmp.ne.s32.totalorder %s63_s23, %s1346_s28  ;;  %p1352_p1 = scmp.lt.s32.totalorder %s1346_s28, %s1346_s28 }
  0x3d   :  { %p1353_p2 = por %p1352_p1, %p1351_p0 }
  0x3f   :  { %p1354_p3 = pnand %p1353_p2, %p1347_p13 }
  0x41   :  { %1357 = shalt.err (!%p1354_p3)
}
  0x42   :  { %s1370_s4 = smov 128   ;;  %s1371_s15 = smov 8  }
  0x43   :  { %68 = dma.hbm_to_vmem [thread:$0]  %s1676_s6, 2048, %s63_s23, [#allocation9], %s1370_s4, %s1370_s4, %s1371_s15  }
  0x44   :  { %1358 = dma.done.wait [#allocation4], 128  }
  0x45   :  { %1359 = vsyncadd [#allocation4], 4294967168 }
  0x46   :  { %1360 = dma.done.wait [#allocation6], 1280  }
  0x47   :  { %1361 = vsyncadd [#allocation6], 4294966016 }
  0x48   :  { %1362 = dma.done.wait [#allocation9], 2048  }
  0x49   :  { %1363 = vsyncadd [#allocation9], 4294965248  ;;  %v1372_v0 = vmov 0.0   ;;  %vm1373_vm0 = vmmov 0   ;;  %v1220_v1 = vld [vmem:[#allocation5] sm:$0xff]   ;;  %vm92_vm1 = vcmask 64512  }
  0x4a   :  { %995 = vmatprep.subr.bf16.mxu1 %v1372_v0  ;;  %999 = vmatprep.mubr.msk.bf16.mxu1 %vm1373_vm0, %v1372_v0  ;;  %v84_v2 = vld [vmem:[#allocation3] sm:$0xff]  ;;  %v83_v4 = vld [vmem:[%s1670_s0 + $0x8] sm:$0xff]  ;;  %v1221_v5 = vld [vmem:[#allocation5 + $0x8] sm:$0xff]   ;;  %vm208_vm2 = vcmask 261120   ;;  %vm269_vm3 = vcmask 1041409  }
  0x4b   :  { %v82_v3 = vld [vmem:[%s1670_s0] sm:$0xff]  ;;  %996 = vmatpush3.bf16.msra.mxu1 %v1220_v1  ;;  %990 = vmatprep.subr.mxu0 %v84_v2  ;;  %v1486_v7 = vld [vmem:[#allocation7] sm:$0xff]   ;;  %v1504_v10 = vld [vmem:[#allocation7 + $0x10] sm:$0xff]  }
  0x4c   :  { %991 = vmatpush3.msra.mxu0 %v84_v2  ;;  %992 = vmatprep.mubr.msk.f32.mxu0 %vm92_vm1, %v82_v3  ;;  %v190_v6 = vld [vmem:[%s1671_s1] sm:$0x3]  ;;  %v1510_v11 = vld [vmem:[#allocation7 + $0x18] sm:$0xff]   ;;  %v1516_v12 = vld [vmem:[#allocation7 + $0x20] sm:$0xff]  }
  0x4d   :  { %997 = vmatprep.subr.bf16.mxu1 %v1372_v0  ;;  %993 = vmatmul.mubr.msk.f32.vlgmr.msra.gmra.mrb[0].mxu0 %vm92_vm1, %v83_v4  ;;  %v191_v8 = vpack.c.bf16 %v190_v6, %v190_v6  ;;  %v1498_v9 = vld [vmem:[#allocation7 + $0x8] sm:$0xff]   ;;  %v1528_v14 = vld [vmem:[#allocation7 + $0x30] sm:$0xff]   ;;  %v1531_v15 = vld [vmem:[#allocation7 + $0x38] sm:$0xff]  }
  0x4e   :  { %1003 = vmatprep.subr.bf16.mxu0 %v1372_v0  ;;  %1019 = vmatprep.mubr.msk.bf16.mxu0 %vm1373_vm0, %v1372_v0  ;;  %v1522_v13 = vld [vmem:[#allocation7 + $0x28] sm:$0xff]  }
  0x4f   :  { %998 = vmatpush3.bf16.msra.mxu1 %v1221_v5  ;;  %1004 = vmatpush3.bf16.msra.mxu0 %v1486_v7  ;;  %v889_v16 = vld [vmem:[%s1675_s5] ss:$0 sm:$0xff] }
  0x50   :  { %1005 = vmatprep.subr.bf16.mxu0 %v1372_v0  ;;  %1023 = vmatprep.subr.bf16.mxu1 %v1372_v0 }
  0x52   :  { %1000 = vmatmul.mubr.msk.bf16.vlgmr.msra.gmra.mrb[0].mxu1 %vm208_vm2, %v191_v8 }
  0x53   :  { %1024 = vmatpush3.bf16.msra.mxu1 %v1486_v7  ;;  %1039 = vmatprep.mubr.msk.bf16.mxu1 %vm1373_vm0, %v1372_v0 }
  0x54   :  { %1025 = vmatprep.subr.bf16.mxu1 %v1372_v0  ;;  %1006 = vmatpush3.bf16.msra.mxu0 %v1498_v9 }
  0x55   :  { %1007 = vmatprep.subr.bf16.mxu0 %v1372_v0 }
  0x57   :  { %1026 = vmatpush3.bf16.msra.mxu1 %v1498_v9 }
  0x58   :  { %1027 = vmatprep.subr.bf16.mxu1 %v1372_v0  ;;  %1008 = vmatpush3.bf16.msra.mxu0 %v1504_v10 }
  0x59   :  { %1009 = vmatprep.subr.bf16.mxu0 %v1372_v0 }
  0x5b   :  { %1028 = vmatpush3.bf16.msra.mxu1 %v1504_v10 }
  0x5c   :  { %1029 = vmatprep.subr.bf16.mxu1 %v1372_v0  ;;  %1010 = vmatpush3.bf16.msra.mxu0 %v1510_v11 }
  0x5d   :  { %1011 = vmatprep.subr.bf16.mxu0 %v1372_v0 }
  0x5f   :  { %1030 = vmatpush3.bf16.msra.mxu1 %v1510_v11 }
  0x60   :  { %1031 = vmatprep.subr.bf16.mxu1 %v1372_v0  ;;  %1012 = vmatpush3.bf16.msra.mxu0 %v1516_v12 }
  0x61   :  { %1013 = vmatprep.subr.bf16.mxu0 %v1372_v0 }
  0x63   :  { %1032 = vmatpush3.bf16.msra.mxu1 %v1516_v12 }
  0x64   :  { %1033 = vmatprep.subr.bf16.mxu1 %v1372_v0  ;;  %1014 = vmatpush3.bf16.msra.mxu0 %v1522_v13 }
  0x65   :  { %1015 = vmatprep.subr.bf16.mxu0 %v1372_v0 }
  0x67   :  { %1034 = vmatpush3.bf16.msra.mxu1 %v1522_v13 }
  0x68   :  { %1035 = vmatprep.subr.bf16.mxu1 %v1372_v0  ;;  %1016 = vmatpush3.bf16.msra.mxu0 %v1528_v14 }
  0x69   :  { %1017 = vmatprep.subr.bf16.mxu0 %v1372_v0 }
  0x6b   :  { %1036 = vmatpush3.bf16.msra.mxu1 %v1528_v14 }
  0x6c   :  { %1037 = vmatprep.subr.bf16.mxu1 %v1372_v0  ;;  %1018 = vmatpush3.bf16.msra.mxu0 %v1531_v15 }
  0x6d   :  { %1043 = vmatprep.subr.bf16.mxu0 %v1372_v0 }
  0x6f   :  { %1038 = vmatpush3.bf16.msra.mxu1 %v1531_v15 }
  0x70   :  { %1063 = vmatprep.subr.bf16.mxu1 %v1372_v0 }
 0x120   :  { %v994_v17 = vpop.f32.mrb[0].mxu0 }
 0x121   :  { %v165_v18 = vpop.f32.mrb[1].mxu0  ;;  %v1545_v20 = vadd.f32 %v994_v17, %v889_v16 }
 0x122   :  { %v1543_v19 = vadd.f32 %v889_v16, %v165_v18 }
 0x125   :  { %v246_v21 = vpop.f32.mrb[0].mxu1 }
 0x126   :  { %v253_v22 = vrot.slane %v246_v21, 1  ;;  %v256_v23 = vadd.f32 %v246_v21, %v1543_v19  ;;  %v1001_v24 = vpop.f32.mrb[1].mxu1 }
 0x127   :  { %v249_v25 = vpop.f32.mrb[2].mxu1 }
 0x128   :  { %v257_v26 = vadd.f32 %v253_v22, %v1545_v20  ;;  %1230 = vtanh.f32 %v256_v23  ;;  %v1002_v27 = vpop.f32.mrb[3].mxu1 }
 0x12a   :  { %1232 = vtanh.f32 %v257_v26 }
 0x132   :  { %v1231_v28 = vpop.eup %1230 }
 0x133   :  { %260 = vst [vmem:[#allocation2] sm:$0x1] %v1231_v28  ;;  %v262_v30 = vpack.c.bf16 %v1231_v28, %v1231_v28 }
 0x134   :  { %v1233_v29 = vpop.eup %1232 }
 0x135   :  { %261 = vst [vmem:[#allocation2 + $0x8] sm:$0x1] %v1233_v29  ;;  %v263_v31 = vpack.c.bf16 %v1233_v29, %v1233_v29  ;;  %v266_v33 = vunpack.c.l.b16 %v262_v30 }
 0x137   :  { %v267_v32 = vunpack.c.l.b16 %v263_v31 }
 0x139   :  { %v268_v34 = vrot.slane %v267_v32, 7 }
 0x13b   :  { %v270_v35 = vsel %vm269_vm3, %v268_v34, %v266_v33 }
 0x13c   :  { %v271_v36 = vpack.c.b16 %v270_v35, %v270_v35 }
 0x13e   :  { %1020 = vmatmul.mubr.bf16.vlgmr.msra.gmra.mrb[4].mxu0 %v271_v36 }
 0x13f   :  { %1044 = vmatpush3.bf16.msra.mxu0 %v1486_v7  ;;  %1059 = vmatprep.mubr.msk.bf16.mxu0 %vm1373_vm0, %v1372_v0 }
 0x140   :  { %1045 = vmatprep.subr.bf16.mxu0 %v1372_v0 }
 0x143   :  { %1046 = vmatpush3.bf16.msra.mxu0 %v1498_v9 }
 0x144   :  { %1047 = vmatprep.subr.bf16.mxu0 %v1372_v0 }
 0x147   :  { %1048 = vmatpush3.bf16.msra.mxu0 %v1504_v10 }
 0x148   :  { %1049 = vmatprep.subr.bf16.mxu0 %v1372_v0 }
 0x14b   :  { %1050 = vmatpush3.bf16.msra.mxu0 %v1510_v11 }
 0x14c   :  { %1051 = vmatprep.subr.bf16.mxu0 %v1372_v0 }
 0x14f   :  { %1052 = vmatpush3.bf16.msra.mxu0 %v1516_v12 }
 0x150   :  { %1053 = vmatprep.subr.bf16.mxu0 %v1372_v0 }
 0x153   :  { %1054 = vmatpush3.bf16.msra.mxu0 %v1522_v13 }
 0x154   :  { %1055 = vmatprep.subr.bf16.mxu0 %v1372_v0 }
 0x157   :  { %1056 = vmatpush3.bf16.msra.mxu0 %v1528_v14 }
 0x158   :  { %1057 = vmatprep.subr.bf16.mxu0 %v1372_v0 }
 0x15b   :  { %1058 = vmatpush3.bf16.msra.mxu0 %v1531_v15 }
 0x15c   :  { %1083 = vmatprep.subr.bf16.mxu0 %v1372_v0 }
 0x211   :  { %v355_v37 = vpop.f32.mrb[4].mxu0 }
 0x212   :  { %v362_v38 = vrot.slane %v355_v37, 7  ;;  %v366_v39 = vadd.f32 %v355_v37, %v1545_v20  ;;  %v1021_v40 = vpop.f32.mrb[5].mxu0 }
 0x213   :  { %v358_v41 = vpop.f32.mrb[6].mxu0 }
 0x214   :  { %v365_v42 = vadd.f32 %v362_v38, %v1543_v19  ;;  %1234 = vtanh.f32 %v366_v39  ;;  %v1022_v43 = vpop.f32.mrb[7].mxu0 }
 0x216   :  { %1236 = vtanh.f32 %v365_v42 }
 0x21e   :  { %v1235_v44 = vpop.eup %1234 }
 0x21f   :  { %370 = vst [vmem:[#allocation2 + $0x8] sm:$0x2] %v1235_v44  ;;  %v372_v47 = vpack.c.bf16 %v1235_v44, %v1235_v44 }
 0x220   :  { %v1237_v45 = vpop.eup %1236 }
 0x221   :  { %369 = vst [vmem:[#allocation2] sm:$0x2] %v1237_v45  ;;  %v371_v46 = vpack.c.bf16 %v1237_v45, %v1237_v45  ;;  %v376_v49 = vunpack.c.l.b16 %v372_v47 }
 0x223   :  { %v375_v48 = vunpack.c.l.b16 %v371_v46 }
 0x225   :  { %v377_v50 = vrot.slane %v375_v48, 1 }
 0x227   :  { %v378_v51 = vsel %vm269_vm3, %v376_v49, %v377_v50 }
 0x228   :  { %v379_v52 = vpack.c.b16 %v378_v51, %v378_v51 }
 0x22a   :  { %1040 = vmatmul.mubr.bf16.vlgmr.msra.gmra.mrb[4].mxu1 %v379_v52 }
 0x22b   :  { %1064 = vmatpush3.bf16.msra.mxu1 %v1486_v7  ;;  %1079 = vmatprep.mubr.msk.bf16.mxu1 %vm1373_vm0, %v1372_v0 }
 0x22c   :  { %1065 = vmatprep.subr.bf16.mxu1 %v1372_v0 }
 0x22f   :  { %1066 = vmatpush3.bf16.msra.mxu1 %v1498_v9 }
 0x230   :  { %1067 = vmatprep.subr.bf16.mxu1 %v1372_v0 }
 0x233   :  { %1068 = vmatpush3.bf16.msra.mxu1 %v1504_v10 }
 0x234   :  { %1069 = vmatprep.subr.bf16.mxu1 %v1372_v0 }
 0x237   :  { %1070 = vmatpush3.bf16.msra.mxu1 %v1510_v11 }
 0x238   :  { %1071 = vmatprep.subr.bf16.mxu1 %v1372_v0 }
 0x23b   :  { %1072 = vmatpush3.bf16.msra.mxu1 %v1516_v12 }
 0x23c   :  { %1073 = vmatprep.subr.bf16.mxu1 %v1372_v0 }
 0x23f   :  { %1074 = vmatpush3.bf16.msra.mxu1 %v1522_v13 }
 0x240   :  { %1075 = vmatprep.subr.bf16.mxu1 %v1372_v0 }
 0x243   :  { %1076 = vmatpush3.bf16.msra.mxu1 %v1528_v14 }
 0x244   :  { %1077 = vmatprep.subr.bf16.mxu1 %v1372_v0 }
 0x247   :  { %1078 = vmatpush3.bf16.msra.mxu1 %v1531_v15 }
 0x248   :  { %1103 = vmatprep.subr.bf16.mxu1 %v1372_v0 }
 0x2fd   :  { %v415_v53 = vpop.f32.mrb[4].mxu1 }
 0x2fe   :  { %v422_v54 = vrot.slane %v415_v53, 6  ;;  %v423_v55 = vrot.slane %v415_v53, 7  ;;  %v1041_v56 = vpop.f32.mrb[5].mxu1 }
 0x2ff   :  { %v418_v57 = vpop.f32.mrb[6].mxu1 }
 0x300   :  { %v426_v58 = vadd.f32 %v422_v54, %v1543_v19  ;;  %v427_v59 = vadd.f32 %v423_v55, %v1545_v20  ;;  %v1042_v60 = vpop.f32.mrb[7].mxu1 }
 0x302   :  { %1238 = vtanh.f32 %v426_v58 }
 0x303   :  { %1240 = vtanh.f32 %v427_v59 }
 0x30c   :  { %v1239_v61 = vpop.eup %1238 }
 0x30d   :  { %v1241_v62 = vpop.eup %1240  ;;  %430 = vst [vmem:[#allocation2] sm:$0x4] %v1239_v61  ;;  %v432_v63 = vpack.c.bf16 %v1239_v61, %v1239_v61 }
 0x30e   :  { %431 = vst [vmem:[#allocation2 + $0x8] sm:$0x4] %v1241_v62  ;;  %v433_v1 = vpack.c.bf16 %v1241_v62, %v1241_v62 }
 0x30f   :  { %v436_v2 = vunpack.c.l.b16 %v432_v63  ;;  %v751_v63 = vld [vmem:[#allocation8] sm:$0xff] }
 0x310   :  { %v437_v3 = vunpack.c.l.b16 %v433_v1  ;;  %v752_v1 = vld [vmem:[#allocation8 + $0x8] sm:$0xff] }
 0x311   :  { %v438_v4 = vrot.slane %v436_v2, 2  ;;  %v753_v2 = vld [vmem:[#allocation8 + $0x10] sm:$0xff] }
 0x312   :  { %v439_v5 = vrot.slane %v437_v3, 1  ;;  %v1178_v3 = vpack.c.bf16 %v752_v1, %v751_v63 }
 0x314   :  { %v440_v6 = vsel %vm269_vm3, %v439_v5, %v438_v4  ;;  %v754_v4 = vld [vmem:[#allocation8 + $0x18] sm:$0xff] }
 0x315   :  { %v441_v8 = vpack.c.b16 %v440_v6, %v440_v6  ;;  %v1182_v5 = vpack.c.bf16 %v754_v4, %v753_v2 }
 0x317   :  { %1060 = vmatmul.mubr.bf16.vlgmr.msra.gmra.mrb[8].mxu0 %v441_v8 }
 0x318   :  { %1084 = vmatpush3.bf16.msra.mxu0 %v1486_v7  ;;  %1099 = vmatprep.mubr.msk.bf16.mxu0 %vm1373_vm0, %v1372_v0 }
 0x319   :  { %1085 = vmatprep.subr.bf16.mxu0 %v1372_v0 }
 0x31c   :  { %1086 = vmatpush3.bf16.msra.mxu0 %v1498_v9 }
 0x31d   :  { %1087 = vmatprep.subr.bf16.mxu0 %v1372_v0 }
 0x320   :  { %1088 = vmatpush3.bf16.msra.mxu0 %v1504_v10 }
 0x321   :  { %1089 = vmatprep.subr.bf16.mxu0 %v1372_v0 }
 0x324   :  { %1090 = vmatpush3.bf16.msra.mxu0 %v1510_v11 }
 0x325   :  { %1091 = vmatprep.subr.bf16.mxu0 %v1372_v0 }
 0x328   :  { %1092 = vmatpush3.bf16.msra.mxu0 %v1516_v12 }
 0x329   :  { %1093 = vmatprep.subr.bf16.mxu0 %v1372_v0 }
 0x32c   :  { %1094 = vmatpush3.bf16.msra.mxu0 %v1522_v13 }
 0x32d   :  { %1095 = vmatprep.subr.bf16.mxu0 %v1372_v0 }
 0x330   :  { %1096 = vmatpush3.bf16.msra.mxu0 %v1528_v14 }
 0x331   :  { %1097 = vmatprep.subr.bf16.mxu0 %v1372_v0 }
 0x334   :  { %1098 = vmatpush3.bf16.msra.mxu0 %v1531_v15 }
 0x335   :  { %1123 = vmatprep.subr.bf16.mxu0 %v1372_v0 }
 0x3ea   :  { %v477_v16 = vpop.f32.mrb[8].mxu0 }
 0x3eb   :  { %v484_v17 = vrot.slane %v477_v16, 5  ;;  %v485_v18 = vrot.slane %v477_v16, 6  ;;  %v1061_v21 = vpop.f32.mrb[9].mxu0 }
 0x3ec   :  { %v480_v22 = vpop.f32.mrb[10].mxu0 }
 0x3ed   :  { %v488_v23 = vadd.f32 %v484_v17, %v1543_v19  ;;  %v489_v24 = vadd.f32 %v485_v18, %v1545_v20  ;;  %v1062_v25 = vpop.f32.mrb[11].mxu0 }
 0x3ef   :  { %1242 = vtanh.f32 %v488_v23 }
 0x3f0   :  { %1244 = vtanh.f32 %v489_v24 }
 0x3f9   :  { %v1243_v26 = vpop.eup %1242 }
 0x3fa   :  { %v1245_v27 = vpop.eup %1244  ;;  %492 = vst [vmem:[#allocation2] sm:$0x8] %v1243_v26  ;;  %v494_v28 = vpack.c.bf16 %v1243_v26, %v1243_v26 }
 0x3fb   :  { %493 = vst [vmem:[#allocation2 + $0x8] sm:$0x8] %v1245_v27  ;;  %v495_v29 = vpack.c.bf16 %v1245_v27, %v1245_v27 }
 0x3fc   :  { %v498_v30 = vunpack.c.l.b16 %v494_v28 }
 0x3fd   :  { %v499_v31 = vunpack.c.l.b16 %v495_v29 }
 0x3fe   :  { %v500_v32 = vrot.slane %v498_v30, 3 }
 0x3ff   :  { %v501_v33 = vrot.slane %v499_v31, 2 }
 0x401   :  { %v502_v34 = vsel %vm269_vm3, %v501_v33, %v500_v32 }
 0x402   :  { %v503_v35 = vpack.c.b16 %v502_v34, %v502_v34  ;;  %v755_v34 = vld [vmem:[#allocation8 + $0x20] sm:$0xff] }
 0x404   :  { %1080 = vmatmul.mubr.bf16.vlgmr.msra.gmra.mrb[8].mxu1 %v503_v35  ;;  %v756_v35 = vld [vmem:[#allocation8 + $0x28] sm:$0xff] }
 0x405   :  { %1104 = vmatpush3.bf16.msra.mxu1 %v1486_v7  ;;  %1119 = vmatprep.mubr.msk.bf16.mxu1 %vm1373_vm0, %v1372_v0 }
 0x406   :  { %1105 = vmatprep.subr.bf16.mxu1 %v1372_v0 }
 0x409   :  { %1106 = vmatpush3.bf16.msra.mxu1 %v1498_v9 }
 0x40a   :  { %1107 = vmatprep.subr.bf16.mxu1 %v1372_v0 }
 0x40d   :  { %1108 = vmatpush3.bf16.msra.mxu1 %v1504_v10 }
 0x40e   :  { %1109 = vmatprep.subr.bf16.mxu1 %v1372_v0 }
 0x411   :  { %1110 = vmatpush3.bf16.msra.mxu1 %v1510_v11 }
 0x412   :  { %1111 = vmatprep.subr.bf16.mxu1 %v1372_v0 }
 0x415   :  { %1112 = vmatpush3.bf16.msra.mxu1 %v1516_v12 }
 0x416   :  { %1113 = vmatprep.subr.bf16.mxu1 %v1372_v0 }
 0x419   :  { %1114 = vmatpush3.bf16.msra.mxu1 %v1522_v13 }
 0x41a   :  { %1115 = vmatprep.subr.bf16.mxu1 %v1372_v0 }
 0x41d   :  { %1116 = vmatpush3.bf16.msra.mxu1 %v1528_v14 }
 0x41e   :  { %1117 = vmatprep.subr.bf16.mxu1 %v1372_v0 }
 0x421   :  { %1118 = vmatpush3.bf16.msra.mxu1 %v1531_v15 }
 0x422   :  { %1179 = vmatprep.subr.bf16.mxu1 %v1178_v3 }
 0x4d7   :  { %v539_v36 = vpop.f32.mrb[8].mxu1 }
 0x4d8   :  { %v546_v37 = vrot.slane %v539_v36, 4  ;;  %v547_v38 = vrot.slane %v539_v36, 5  ;;  %v1081_v39 = vpop.f32.mrb[9].mxu1  ;;  %v1186_v36 = vpack.c.bf16 %v756_v35, %v755_v34 }
 0x4d9   :  { %v542_v40 = vpop.f32.mrb[10].mxu1 }
 0x4da   :  { %v550_v41 = vadd.f32 %v546_v37, %v1543_v19  ;;  %v551_v42 = vadd.f32 %v547_v38, %v1545_v20  ;;  %v1082_v43 = vpop.f32.mrb[11].mxu1  ;;  %v757_v37 = vld [vmem:[#allocation8 + $0x30] sm:$0xff]  ;;  %v758_v38 = vld [vmem:[#allocation8 + $0x38] sm:$0xff]  ;;  %v759_v40 = vld [vmem:[#allocation8 + $0x40] sm:$0xff] }
 0x4db   :  { %v1190_v39 = vpack.c.bf16 %v758_v38, %v757_v37  ;;  %v761_v43 = vld [vmem:[#allocation8 + $0x50] sm:$0xff] }
 0x4dc   :  { %1246 = vtanh.f32 %v550_v41  ;;  %v760_v41 = vld [vmem:[#allocation8 + $0x48] sm:$0xff] }
 0x4dd   :  { %1248 = vtanh.f32 %v551_v42  ;;  %v1194_v42 = vpack.c.bf16 %v760_v41, %v759_v40 }
 0x4e6   :  { %v1247_v44 = vpop.eup %1246 }
 0x4e7   :  { %v1249_v45 = vpop.eup %1248  ;;  %554 = vst [vmem:[#allocation2] sm:$0x10] %v1247_v44  ;;  %v556_v46 = vpack.c.bf16 %v1247_v44, %v1247_v44  ;;  %v762_v44 = vld [vmem:[#allocation8 + $0x58] sm:$0xff] }
 0x4e8   :  { %555 = vst [vmem:[#allocation2 + $0x8] sm:$0x10] %v1249_v45  ;;  %v557_v47 = vpack.c.bf16 %v1249_v45, %v1249_v45  ;;  %v1198_v45 = vpack.c.bf16 %v762_v44, %v761_v43 }
 0x4e9   :  { %v560_v48 = vunpack.c.l.b16 %v556_v46  ;;  %v763_v46 = vld [vmem:[#allocation8 + $0x60] sm:$0xff] }
 0x4ea   :  { %v561_v49 = vunpack.c.l.b16 %v557_v47  ;;  %v764_v47 = vld [vmem:[#allocation8 + $0x68] sm:$0xff] }
 0x4eb   :  { %v562_v50 = vrot.slane %v560_v48, 4  ;;  %v1202_v48 = vpack.c.bf16 %v764_v47, %v763_v46 }
 0x4ec   :  { %v563_v51 = vrot.slane %v561_v49, 3  ;;  %v765_v49 = vld [vmem:[#allocation8 + $0x70] sm:$0xff] }
 0x4ee   :  { %v564_v52 = vsel %vm269_vm3, %v563_v51, %v562_v50  ;;  %v766_v50 = vld [vmem:[#allocation8 + $0x78] sm:$0xff] }
 0x4ef   :  { %v565_v53 = vpack.c.b16 %v564_v52, %v564_v52  ;;  %v1206_v51 = vpack.c.bf16 %v766_v50, %v765_v49 }
 0x4f1   :  { %1100 = vmatmul.mubr.bf16.vlgmr.msra.gmra.mrb[12].mxu0 %v565_v53 }
 0x4f2   :  { %1124 = vmatpush3.bf16.msra.mxu0 %v1486_v7  ;;  %1139 = vmatprep.mubr.msk.bf16.mxu0 %vm1373_vm0, %v1372_v0 }
 0x4f3   :  { %1125 = vmatprep.subr.bf16.mxu0 %v1372_v0 }
 0x4f6   :  { %1126 = vmatpush3.bf16.msra.mxu0 %v1498_v9 }
 0x4f7   :  { %1127 = vmatprep.subr.bf16.mxu0 %v1372_v0 }
 0x4fa   :  { %1128 = vmatpush3.bf16.msra.mxu0 %v1504_v10 }
 0x4fb   :  { %1129 = vmatprep.subr.bf16.mxu0 %v1372_v0 }
 0x4fe   :  { %1130 = vmatpush3.bf16.msra.mxu0 %v1510_v11 }
 0x4ff   :  { %1131 = vmatprep.subr.bf16.mxu0 %v1372_v0 }
 0x502   :  { %1132 = vmatpush3.bf16.msra.mxu0 %v1516_v12 }
 0x503   :  { %1133 = vmatprep.subr.bf16.mxu0 %v1372_v0 }
 0x506   :  { %1134 = vmatpush3.bf16.msra.mxu0 %v1522_v13 }
 0x507   :  { %1135 = vmatprep.subr.bf16.mxu0 %v1372_v0 }
 0x50a   :  { %1136 = vmatpush3.bf16.msra.mxu0 %v1528_v14 }
 0x50b   :  { %1137 = vmatprep.subr.bf16.mxu0 %v1372_v0 }
 0x50e   :  { %1138 = vmatpush3.bf16.msra.mxu0 %v1531_v15 }
 0x5c4   :  { %v601_v7 = vpop.f32.mrb[12].mxu0 }
 0x5c5   :  { %v608_v9 = vrot.slane %v601_v7, 3  ;;  %v609_v10 = vrot.slane %v601_v7, 4  ;;  %v1101_v11 = vpop.f32.mrb[13].mxu0 }
 0x5c6   :  { %v604_v54 = vpop.f32.mrb[14].mxu0 }
 0x5c7   :  { %v612_v55 = vadd.f32 %v608_v9, %v1543_v19  ;;  %v613_v12 = vadd.f32 %v609_v10, %v1545_v20  ;;  %v1102_v56 = vpop.f32.mrb[15].mxu0 }
 0x5c9   :  { %1250 = vtanh.f32 %v612_v55 }
 0x5ca   :  { %1252 = vtanh.f32 %v613_v12 }
 0x5d3   :  { %v1251_v13 = vpop.eup %1250 }
 0x5d4   :  { %v1253_v57 = vpop.eup %1252  ;;  %616 = vst [vmem:[#allocation2] sm:$0x20] %v1251_v13  ;;  %v618_v14 = vpack.c.bf16 %v1251_v13, %v1251_v13 }
 0x5d5   :  { %617 = vst [vmem:[#allocation2 + $0x8] sm:$0x20] %v1253_v57  ;;  %v619_v0 = vpack.c.bf16 %v1253_v57, %v1253_v57 }
 0x5d6   :  { %v622_v58 = vunpack.c.l.b16 %v618_v14 }
 0x5d7   :  { %v623_v15 = vunpack.c.l.b16 %v619_v0 }
 0x5d8   :  { %v624_v59 = vrot.slane %v622_v58, 5 }
 0x5d9   :  { %v625_v60 = vrot.slane %v623_v15, 4 }
 0x5db   :  { %v626_v61 = vsel %vm269_vm3, %v625_v60, %v624_v59 }
 0x5dc   :  { %v627_v62 = vpack.c.b16 %v626_v61, %v626_v61 }
 0x5de   :  { %1120 = vmatmul.mubr.bf16.vlgmr.msra.gmra.mrb[12].mxu1 %v627_v62 }
 0x5df   :  { %1181 = vmatpush3.bf16.msra.mxu1 %v1178_v3 }
 0x5e0   :  { %1183 = vmatprep.subr.bf16.mxu1 %v1182_v5 }
 0x5e3   :  { %1185 = vmatpush3.bf16.msra.mxu1 %v1182_v5 }
 0x5e4   :  { %1187 = vmatprep.subr.bf16.mxu1 %v1186_v36 }
 0x5e7   :  { %1189 = vmatpush3.bf16.msra.mxu1 %v1186_v36 }
 0x5e8   :  { %1191 = vmatprep.subr.bf16.mxu1 %v1190_v39 }
 0x5eb   :  { %1193 = vmatpush3.bf16.msra.mxu1 %v1190_v39 }
 0x5ec   :  { %1195 = vmatprep.subr.bf16.mxu1 %v1194_v42 }
 0x5ef   :  { %1197 = vmatpush3.bf16.msra.mxu1 %v1194_v42 }
 0x5f0   :  { %1199 = vmatprep.subr.bf16.mxu1 %v1198_v45 }
 0x5f3   :  { %1201 = vmatpush3.bf16.msra.mxu1 %v1198_v45 }
 0x5f4   :  { %1203 = vmatprep.subr.bf16.mxu1 %v1202_v48 }
 0x5f7   :  { %1205 = vmatpush3.bf16.msra.mxu1 %v1202_v48 }
 0x5f8   :  { %1207 = vmatprep.subr.bf16.mxu1 %v1206_v51 }
 0x5fb   :  { %1209 = vmatpush3.bf16.msra.mxu1 %v1206_v51 }
 0x6b1   :  { %v663_v6 = vpop.f32.mrb[12].mxu1 }
 0x6b2   :  { %v670_v8 = vrot.slane %v663_v6, 2  ;;  %v671_v16 = vrot.slane %v663_v6, 3  ;;  %v1121_v17 = vpop.f32.mrb[13].mxu1 }
 0x6b3   :  { %v666_v18 = vpop.f32.mrb[14].mxu1 }
 0x6b4   :  { %v674_v21 = vadd.f32 %v670_v8, %v1543_v19  ;;  %v675_v22 = vadd.f32 %v671_v16, %v1545_v20  ;;  %v1122_v23 = vpop.f32.mrb[15].mxu1 }
 0x6b6   :  { %1254 = vtanh.f32 %v674_v21 }
 0x6b7   :  { %1256 = vtanh.f32 %v675_v22 }
 0x6c0   :  { %v1255_v24 = vpop.eup %1254 }
 0x6c1   :  { %v1257_v25 = vpop.eup %1256  ;;  %678 = vst [vmem:[#allocation2] sm:$0x40] %v1255_v24  ;;  %v680_v26 = vpack.c.bf16 %v1255_v24, %v1255_v24 }
 0x6c2   :  { %679 = vst [vmem:[#allocation2 + $0x8] sm:$0x40] %v1257_v25  ;;  %v681_v27 = vpack.c.bf16 %v1257_v25, %v1257_v25 }
 0x6c3   :  { %v684_v28 = vunpack.c.l.b16 %v680_v26 }
 0x6c4   :  { %v685_v29 = vunpack.c.l.b16 %v681_v27 }
 0x6c5   :  { %v686_v30 = vrot.slane %v684_v28, 6 }
 0x6c6   :  { %v687_v31 = vrot.slane %v685_v29, 5 }
 0x6c8   :  { %v688_v32 = vsel %vm269_vm3, %v687_v31, %v686_v30 }
 0x6c9   :  { %v689_v33 = vpack.c.b16 %v688_v32, %v688_v32 }
 0x6cb   :  { %1140 = vmatmul.mubr.bf16.vlgmr.msra.gmra.mrb[16].mxu0 %v689_v33 }
 0x79e   :  { %v725_v52 = vpop.f32.mrb[16].mxu0 }
 0x79f   :  { %v732_v53 = vrot.slane %v725_v52, 1  ;;  %v733_v7 = vrot.slane %v725_v52, 2  ;;  %v1141_v9 = vpop.f32.mrb[17].mxu0 }
 0x7a0   :  { %v728_v10 = vpop.f32.mrb[18].mxu0 }
 0x7a1   :  { %v736_v11 = vadd.f32 %v732_v53, %v1543_v19  ;;  %v737_v54 = vadd.f32 %v733_v7, %v1545_v20  ;;  %v1142_v55 = vpop.f32.mrb[19].mxu0 }
 0x7a3   :  { %1258 = vtanh.f32 %v736_v11 }
 0x7a4   :  { %1260 = vtanh.f32 %v737_v54 }
 0x7ad   :  { %v1259_v12 = vpop.eup %1258 }
 0x7ae   :  { %v1261_v56 = vpop.eup %1260  ;;  %740 = vst [vmem:[#allocation2] sm:$0x80] %v1259_v12  ;;  %747 = vst [vmem:[%s1678_s8 - $0x7] sm:$0x80] %v1259_v12 }
 0x7af   :  { %741 = vst [vmem:[#allocation2 + $0x8] sm:$0x80] %v1261_v56  ;;  %v744_v13 = vrot.slane %v1261_v56, 7 }
 0x7b1   :  { %748 = vst [vmem:[%s1678_s8 + $0x1] sm:$0x1] %v744_v13 }
 0x7b5   :  { %v749_v57 = vld [vmem:[#allocation2] sm:$0xff] }
 0x7b6   :  { %1175 = vmatprep.mubr.f32.mxu1 %v749_v57  ;;  %v750_v19 = vld [vmem:[#allocation2 + $0x8] sm:$0xff] }
 0x7b7   :  { %1176 = vmatmul.mubr.f32.vlgmr.msra.gmra.mrb[16].mxu1 %v750_v19 }
 0x88a   :  { %v1177_v20 = vpop.f32.mrb[16].mxu1 }
 0x88b   :  { %v848_v14 = vrot.slane %v1177_v20, 4  ;;  %v833_v0 = vpop.f32.mrb[17].mxu1 }
 0x88c   :  { %v842_v58 = vrot.slane %v833_v0, 4 }
 0x88d   :  { %v849_v15 = vmax.f32 %v1177_v20, %v848_v14 }
 0x88e   :  { %v843_v59 = vmax.f32 %v833_v0, %v842_v58 }
 0x88f   :  { %v850_v60 = vrot.slane %v849_v15, 2 }
 0x890   :  { %v844_v61 = vrot.slane %v843_v59, 2 }
 0x891   :  { %v851_v62 = vmax.f32 %v849_v15, %v850_v60 }
 0x892   :  { %v845_v63 = vmax.f32 %v843_v59, %v844_v61 }
 0x893   :  { %v852_v1 = vrot.slane %v851_v62, 1 }
 0x894   :  { %v846_v2 = vrot.slane %v845_v63, 1 }
 0x895   :  { %v853_v3 = vmax.f32 %v851_v62, %v852_v1 }
 0x896   :  { %v847_v4 = vmax.f32 %v845_v63, %v846_v2 }
 0x897   :  { %v855_v5 = vsub.f32 %v1177_v20, %v853_v3 }
 0x898   :  { %v854_v6 = vsub.f32 %v833_v0, %v847_v4 }
 0x899   :  { %v858_v8 = vmul.f32 1.442695, %v855_v5 }
 0x89a   :  { %v856_v16 = vmul.f32 1.442695, %v854_v6 }
 0x89b   :  { %1262 = vpow2.f32 %v858_v8 }
 0x89c   :  { %1264 = vpow2.f32 %v856_v16 }
 0x8a5   :  { %v1263_v17 = vpop.eup %1262 }
 0x8a6   :  { %v1265_v18 = vpop.eup %1264  ;;  %v866_v21 = vrot.slane %v1263_v17, 4 }
 0x8a7   :  { %v860_v22 = vrot.slane %v1265_v18, 4 }
 0x8a8   :  { %v867_v23 = vadd.f32 %v1263_v17, %v866_v21 }
 0x8a9   :  { %v861_v24 = vadd.f32 %v1265_v18, %v860_v22 }
 0x8aa   :  { %v868_v25 = vrot.slane %v867_v23, 2 }
 0x8ab   :  { %v862_v26 = vrot.slane %v861_v24, 2 }
 0x8ac   :  { %v869_v27 = vadd.f32 %v868_v25, %v867_v23 }
 0x8ad   :  { %v863_v28 = vadd.f32 %v862_v26, %v861_v24 }
 0x8ae   :  { %v870_v29 = vrot.slane %v869_v27, 1 }
 0x8af   :  { %v864_v30 = vrot.slane %v863_v28, 1 }
 0x8b0   :  { %v871_v31 = vadd.f32 %v870_v29, %v869_v27 }
 0x8b1   :  { %v865_v32 = vadd.f32 %v864_v30, %v863_v28 }
 0x8b2   :  { %1266 = vrcp.f32 %v871_v31 }
 0x8b3   :  { %1268 = vrcp.f32 %v865_v32 }
 0x8bc   :  { %v1267_v33 = vpop.eup %1266 }
 0x8bd   :  { %v1269_v34 = vpop.eup %1268  ;;  %v875_v35 = vmul.f32 %v1267_v33, %v1263_v17 }
 0x8be   :  { %v874_v36 = vmul.f32 %v1269_v34, %v1265_v18 }
 0x8bf   :  { %877 = vst [vmem:[%s1677_s7 + $0x8] sm:$0xff] %v875_v35 }
 0x8c0   :  { %876 = vst [vmem:[%s1677_s7] sm:$0xff] %v874_v36 }
 0x8c1   :  { %886 = vsyncpa [#allocation4], 1 }
 0x8c2   :  { %887 = vsyncpa [#allocation6], 1 }
 0x8c3   :  { %888 = vsyncpa [#allocation9], 1 }

</bundles_post_ra>
